<compile_context>
chip_gen: v7x
topology: tpu7x:2x2x1
jax: 0.10.0
libtpu: 0.0.40
codegen_flags: <defaults>
</compile_context>

<pallas_src>
import jax
import jax.numpy as jnp
from jax.experimental import pallas as pl
from jax.experimental.pallas import tpu as pltpu


# -------------------- fused kernel --------------------

def _fused_kernel(x_ref, w_ref, ss_ref, o_ref, acc_ref):
    # x_ref:   (1, C+1, T_HW) bf16  channels-first; last channel is constant 1
    #                               (bias channel); HW on the 128-lane axis.
    # w_ref:   (C+1, T_F)     bf16  pixel-norm folded weights; last row = bias.
    # ss_ref:  (2, T_F)       f32   row 0: gamma*rsqrt(rvar+eps)/HW
    #                               row 1: beta - rmean*gamma*rsqrt(rvar+eps)
    # o_ref:   (1, 1, T_F)    f32   pooled + BN'd features (lane-dense in F)
    # acc_ref: (1, T_F)       f32   running spatial sum (VMEM scratch)
    h = pl.program_id(2)

    @pl.when(h == 0)
    def _():
        acc_ref[...] = jnp.zeros_like(acc_ref)

    x = x_ref[0]                                         # (C+1, T_HW) bf16
    # 1x1-conv stand-in + bias in a single MXU pass: contract the channel axis
    # of x with the channel axis of w -> (T_HW, T_F), F lane-dense, f32 accum.
    y = jax.lax.dot_general(
        x, w_ref[...],
        dimension_numbers=(((0,), (0,)), ((), ())),
        preferred_element_type=jnp.float32)              # (T_HW, T_F)
    y = jnp.maximum(y, 0.0)                              # ReLU (only VALU pass)
    # Partial global-avg-pool over this HW tile (exact f32 sum; the 1/HW
    # factor is folded into ss_ref row 0).  Leave as a reduce so the
    # cross-sublane part stays off the saturating VALU slot.
    acc_ref[...] += jnp.sum(y, axis=0, keepdims=True)    # (1, T_F)

    @pl.when(h == pl.num_programs(2) - 1)
    def _():
        # pooled mean * BN scale + BN shift (mean & BN folded into scale/shift)
        o_ref[0] = (acc_ref[...] * ss_ref[0:1, :] + ss_ref[1:2, :]
                    ).astype(o_ref.dtype)


# -------------------- tiling / VMEM helpers --------------------

def _round_up(x, m):
    return ((x + m - 1) // m) * m


def _tpu_vmem_budget():
    """Half of per-core VMEM (headroom for Mosaic internal scratch).

    128 MiB on v5e/v6e -> 64 MiB budget; 64 MiB per-TC on v7x -> 32 MiB.
    """
    try:
        cap = int(pltpu.get_tpu_info().vmem_capacity_bytes)
    except Exception:
        cap = 64 << 20  # conservative fallback (v7x per-TC)
    return min(cap // 2, 64 << 20)


def _vmem_estimate(t_hw, t_f, c_aug):
    c_pad = _round_up(c_aug, 16)              # bf16 sublane packing
    x_blk = 2 * c_pad * t_hw * 2              # double-buffered bf16 x tile
    w_blk = 2 * c_pad * t_f * 2               # double-buffered bf16 weights
    ss_blk = 2 * 8 * t_f * 4                  # packed (2, F) BN constants
    out_blk = 2 * 8 * t_f * 4                 # (1, 1, t_f) f32 output block
    acc = 8 * t_f * 4                         # f32 accumulator scratch
    y = t_hw * t_f * 4                        # f32 (t_hw, t_f) conv intermediate
    return x_blk + w_blk + ss_blk + out_blk + acc + y


def _pick_f_tile(f):
    if f <= 512:
        return f
    for t in (256, 512, 128):                 # MXU-friendly, lane-dense tiles
        if f % t == 0:
            return t
    return f


def _pick_hw_tile(hw, t_f, c_aug, budget):
    """Largest multiple-of-128 divisor of hw whose working set fits budget."""
    t = hw - (hw % 128) if hw > 128 else hw
    while t >= 128:
        if hw % t == 0 and _vmem_estimate(t, t_f, c_aug) <= budget:
            return t
        t -= 128
    # TODO(synk): HW without a multiple-of-128 divisor needs OOB-lane masking
    # of the pooled sum; fall back to a single full-extent block for now.
    return hw


# -------------------- wrapper --------------------

def baseline_forward(x_nchw, params, *, t_hw=None, t_f=None):
    N, C, H, W = x_nchw.shape
    HW = H * W
    F = params["w"].shape[1]
    C_aug = C + 1

    # ---- host-side (one-time) parameter folding, all in f32 ----
    inv_std = 1.0 / params["pixel_std"]                             # (C,)
    w_eff = params["w"] * inv_std[:, None]                          # (C, F)
    b_eff = params["b"] - (params["pixel_mean"] * inv_std) @ params["w"]  # (F,)
    # Bias folded into the matmul: an extra weight row paired with a
    # constant-1 channel appended to x (C=4 sublanes already pad to 16 for
    # bf16, so the extra row is free in VMEM/DMA footprint).
    w_aug = jnp.concatenate([w_eff, b_eff[None, :]],
                            axis=0).astype(jnp.bfloat16)            # (C+1, F)

    bn_scale = params["gamma"] * jax.lax.rsqrt(params["rvar"] + 1e-5)
    bn_shift = params["beta"] - params["rmean"] * bn_scale
    # Pack per-F constants into one lane-dense (2, F) operand; fold 1/HW.
    ss = jnp.stack([bn_scale / HW, bn_shift], axis=0).astype(jnp.float32)

    # channels-first, spatial flattened onto the lane axis; bf16 for the MXU.
    x_r = x_nchw.reshape(N, C, HW)
    x_aug = jnp.concatenate(
        [x_r, jnp.ones((N, 1, HW), x_r.dtype)],
        axis=1).astype(jnp.bfloat16)                                 # (N, C+1, HW)

    budget = _tpu_vmem_budget()
    if t_f is None:
        t_f = _pick_f_tile(F)
    assert F % t_f == 0, (F, t_f)
    if t_hw is None:
        t_hw = _pick_hw_tile(HW, t_f, C_aug, budget)
    # TODO(synk): remainder HW tiles would need masking of the OOB lanes in
    # the pooled sum; for now require an even split.
    assert HW % t_hw == 0, (HW, t_hw)
    n_f = F // t_f
    n_hw = HW // t_hw

    out = pl.pallas_call(
        _fused_kernel,
        out_shape=jax.ShapeDtypeStruct((N, 1, F), jnp.float32),
        grid=(N, n_f, n_hw),
        in_specs=[
            pl.BlockSpec((1, C_aug, t_hw), lambda n, f, h: (n, 0, h)),  # x
            pl.BlockSpec((C_aug, t_f),     lambda n, f, h: (0, f)),     # w + bias
            pl.BlockSpec((2, t_f),         lambda n, f, h: (0, f)),     # BN consts
        ],
        out_specs=pl.BlockSpec((1, 1, t_f), lambda n, f, h: (n, 0, f)),
        scratch_shapes=[pltpu.VMEM((1, t_f), jnp.float32)],
        compiler_params=pltpu.CompilerParams(
            dimension_semantics=("parallel", "parallel", "arbitrary"),
            vmem_limit_bytes=budget),
    )(x_aug, w_aug, ss)

    return out.reshape(N, F)


# -------------------- reference (pure JAX, f32) --------------------

def baseline_forward_ref(x_nchw, params):
    N, C, H, W = x_nchw.shape
    xn = (x_nchw - params["pixel_mean"][None, :, None, None]) \
         / params["pixel_std"][None, :, None, None]
    xr = jnp.transpose(xn, (0, 2, 3, 1)).reshape(N, H * W, C)
    y = jnp.maximum(xr @ params["w"] + params["b"][None, None, :], 0.0)
    pooled = y.mean(axis=1)                                     # global avg pool
    inv = jax.lax.rsqrt(params["rvar"] + 1e-5)                  # BN (eval)
    return (pooled - params["rmean"]) * inv * params["gamma"] + params["beta"]


# -------------------- main --------------------

if __name__ == "__main__":
    N, C, H, W = 2, 4, 16, 16       # small stand-in shapes
    F = 128                         # stand-in for in_feat=2048

    key = jax.random.PRNGKey(0)
    k_x, k_w, k_g, k_rm, k_rv = jax.random.split(key, 5)

    x = jax.random.normal(k_x, (N, C, H, W), dtype=jnp.float32)

    params = {
        # buffers from __init__ (pixel_mean / pixel_std, view(1,-1,1,1))
        "pixel_mean": jnp.array([0.485, 0.456, 0.406, 0.45], dtype=jnp.float32),
        "pixel_std":  jnp.array([0.229, 0.224, 0.225, 0.23], dtype=jnp.float32),
        # synthetic backbone (1x1 conv) params
        "w": jax.random.normal(k_w, (C, F), dtype=jnp.float32) * (2.0 / C) ** 0.5,
        "b": jnp.zeros((F,), dtype=jnp.float32),
        # head BN (eval mode): weights_init_kaiming -> gamma~N(1,0.02), beta=0
        "gamma": 1.0 + 0.02 * jax.random.normal(k_g, (F,), dtype=jnp.float32),
        "beta":  jnp.zeros((F,), dtype=jnp.float32),
        "rmean": 0.1 * jax.random.normal(k_rm, (F,), dtype=jnp.float32),
        "rvar":  jnp.abs(jax.random.normal(k_rv, (F,), dtype=jnp.float32)) + 1.0,
    }

    # t_hw=128 -> 2 HW grid steps, exercising the pooled-sum accumulator.
    out = jax.block_until_ready(baseline_forward(x, params, t_hw=128))
    ref = jax.block_until_ready(baseline_forward_ref(x, params))

    assert out.shape == (N, F), out.shape
    # bf16 MXU inputs (incl. folded bias row) vs f32 reference.
    assert jnp.allclose(out, ref, atol=5e-2, rtol=5e-2), \
        float(jnp.max(jnp.abs(out - ref)))
    print("KERNEL_OK")
</pallas_src>

<mosaic_0001>
module attributes {stable_mosaic.version = 11 : i64} {
  func.func @_fused_kernel(%arg0: i32, %arg1: i32, %arg2: i32, %arg3: memref<1x5x128xbf16, #tpu.memory_space<vmem>>, %arg4: memref<5x128xbf16, #tpu.memory_space<vmem>>, %arg5: memref<2x128xf32, #tpu.memory_space<vmem>>, %arg6: memref<1x1x128xf32, #tpu.memory_space<vmem>>, %arg7: memref<1x128xf32, #tpu.memory_space<vmem>>) attributes {dimension_semantics = [#tpu.dimension_semantics<parallel>, #tpu.dimension_semantics<parallel>, #tpu.dimension_semantics<arbitrary>], iteration_bounds = array<i64: 2, 1, 2>, scalar_prefetch = 0 : i64, scratch_operands = 1 : i64, tpu.core_type = #tpu.core_type<tc>, window_params = [{transform_indices = @transform_0, window_bounds = array<i64: 1, 5, 128>}, {transform_indices = @transform_1, window_bounds = array<i64: 5, 128>}, {transform_indices = @transform_2, window_bounds = array<i64: 2, 128>}, {transform_indices = @transform_3, window_bounds = array<i64: 1, 1, 128>}]} {
    %c0_i32 = arith.constant 0 : i32
    %0 = arith.cmpi eq, %arg2, %c0_i32 : i32
    %1 = arith.extui %0 : i1 to i32
    %c0_i32_0 = arith.constant 0 : i32
    %2 = arith.cmpi ne, %1, %c0_i32_0 : i32
    scf.if %2 {
      %cst_12 = arith.constant 0.000000e+00 : f32
      %17 = vector.broadcast %cst_12 : f32 to vector<1x128xf32>
      %c0_13 = arith.constant 0 : index
      %c0_14 = arith.constant 0 : index
      %18 = vector.load %arg7[%c0_13, %c0_14] : memref<1x128xf32, #tpu.memory_space<vmem>>, vector<1x128xf32>
      tpu.vector_store %arg7[%c0_13, %c0_14], %17 {strides = array<i32>} : memref<1x128xf32, #tpu.memory_space<vmem>>, vector<1x128xf32>,
    } else {
    }
    %c0 = arith.constant 0 : index
    %c0_1 = arith.constant 0 : index
    %c0_2 = arith.constant 0 : index
    %3 = vector.load %arg3[%c0, %c0_1, %c0_2] : memref<1x5x128xbf16, #tpu.memory_space<vmem>>, vector<1x5x128xbf16>
    %4 = vector.shape_cast %3 : vector<1x5x128xbf16> to vector<5x128xbf16>
    %c0_3 = arith.constant 0 : index
    %c0_4 = arith.constant 0 : index
    %5 = vector.load %arg4[%c0_3, %c0_4] : memref<5x128xbf16, #tpu.memory_space<vmem>>, vector<5x128xbf16>
    %cst = arith.constant dense<0.000000e+00> : vector<128x128xf32>
    %6 = tpu.matmul %4, %5, %cst {dimension_numbers = #tpu.dot_dimension_numbers<[0], [0], [1], [1], [0, 1, 1, 1], [], []>} : vector<5x128xbf16>, vector<5x128xbf16>, vector<128x128xf32> -> vector<128x128xf32>
    %cst_5 = arith.constant 0.000000e+00 : f32
    %7 = vector.broadcast %cst_5 : f32 to vector<128x128xf32>
    %8 = arith.maximumf %6, %7 : vector<128x128xf32>
    %c0_6 = arith.constant 0 : index
    %c0_7 = arith.constant 0 : index
    %9 = vector.load %arg7[%c0_6, %c0_7] : memref<1x128xf32, #tpu.memory_space<vmem>>, vector<1x128xf32>
    %cst_8 = arith.constant dense<0.000000e+00> : vector<128xf32>
    %10 = vector.multi_reduction <add>, %8, %cst_8 [0] : vector<128x128xf32> to vector<128xf32>
    %11 = vector.shape_cast %10 : vector<128xf32> to vector<1x128xf32>
    %12 = arith.addf %9, %11 : vector<1x128xf32>
    %c0_9 = arith.constant 0 : index
    %c0_10 = arith.constant 0 : index
    %13 = vector.load %arg7[%c0_9, %c0_10] : memref<1x128xf32, #tpu.memory_space<vmem>>, vector<1x128xf32>
    tpu.vector_store %arg7[%c0_9, %c0_10], %12 {strides = array<i32>} : memref<1x128xf32, #tpu.memory_space<vmem>>, vector<1x128xf32>,
    %c1_i32 = arith.constant 1 : i32
    %14 = arith.cmpi eq, %arg2, %c1_i32 : i32
    %15 = arith.extui %14 : i1 to i32
    %c0_i32_11 = arith.constant 0 : i32
    %16 = arith.cmpi ne, %15, %c0_i32_11 : i32
    scf.if %16 {
      %c0_12 = arith.constant 0 : index
      %c0_13 = arith.constant 0 : index
      %17 = vector.load %arg7[%c0_12, %c0_13] : memref<1x128xf32, #tpu.memory_space<vmem>>, vector<1x128xf32>
      %c0_14 = arith.constant 0 : index
      %c0_15 = arith.constant 0 : index
      %18 = vector.load %arg5[%c0_14, %c0_15] : memref<2x128xf32, #tpu.memory_space<vmem>>, vector<1x128xf32>
      %19 = arith.mulf %17, %18 : vector<1x128xf32>
      %c1 = arith.constant 1 : index
      %c0_16 = arith.constant 0 : index
      %20 = vector.load %arg5[%c1, %c0_16] : memref<2x128xf32, #tpu.memory_space<vmem>>, vector<1x128xf32>
      %21 = arith.addf %19, %20 : vector<1x128xf32>
      %c0_17 = arith.constant 0 : index
      %c0_18 = arith.constant 0 : index
      %c0_19 = arith.constant 0 : index
      %22 = vector.load %arg6[%c0_17, %c0_18, %c0_19] : memref<1x1x128xf32, #tpu.memory_space<vmem>>, vector<1x1x128xf32>
      %23 = vector.shape_cast %22 : vector<1x1x128xf32> to vector<1x128xf32>
      %24 = vector.shape_cast %21 : vector<1x128xf32> to vector<1x1x128xf32>
      tpu.vector_store %arg6[%c0_17, %c0_18, %c0_19], %24 {strides = array<i32>} : memref<1x1x128xf32, #tpu.memory_space<vmem>>, vector<1x1x128xf32>,
    } else {
    }
    return
  }
  func.func @transform_0(%arg0: i32, %arg1: i32, %arg2: i32) -> (i32, i32, i32) {
    %c0_i32 = arith.constant 0 : i32
    %c0_i32_0 = arith.constant 0 : i32
    return %arg0, %c0_i32, %arg2 : i32, i32, i32
  }
  func.func @transform_1(%arg0: i32, %arg1: i32, %arg2: i32) -> (i32, i32) {
    %c0_i32 = arith.constant 0 : i32
    %c0_i32_0 = arith.constant 0 : i32
    return %c0_i32, %arg1 : i32, i32
  }
  func.func @transform_2(%arg0: i32, %arg1: i32, %arg2: i32) -> (i32, i32) {
    %c0_i32 = arith.constant 0 : i32
    %c0_i32_0 = arith.constant 0 : i32
    return %c0_i32, %arg1 : i32, i32
  }
  func.func @transform_3(%arg0: i32, %arg1: i32, %arg2: i32) -> (i32, i32, i32) {
    %c0_i32 = arith.constant 0 : i32
    %c0_i32_0 = arith.constant 0 : i32
    return %arg0, %c0_i32, %arg1 : i32, i32, i32
  }
}

</mosaic_0001>

<bundles_post_ra>
// kernel: tpu_custom_call.1
= control target key start
LH: loop header
LB: loop body
LE: loop exit
PB: predicated region body
PF: predicated region fallthrough
CT: control target
= control target key end

     0   :  { %8 = vsyncpa [#allocation4], 0  ;;  %s956_s0 = inlined_call_operand.vmem [shape: bf16[2,5,256], index: 0, kind: input, shape index: {}]   ;;  %s957_s1 = inlined_call_operand.vmem [shape: bf16[5,128], index: 1, kind: input, shape index: {}]   ;;  %s958_s2 = inlined_call_operand.vmem [shape: f32[2,128], index: 2, kind: input, shape index: {}]   ;;  %s959_s3 = inlined_call_operand.hbm [shape: f32[2,1,128], index: 3, kind: output, shape index: {}]  }
   0x1   :  { %10 = vsyncpa [#allocation4 + $0x1], 0  ;;  %s801_s12 = smov 0   ;;  %s803_s13 = smov 0  }
   0x2   :  { %s805_s14 = smov 0   ;;  %s807_s15 = smov 0  }
   0x3   :  { %s809_s16 = smov 0   ;;  %s811_s17 = smov 0  }
   0x4   :  { %s813_s18 = smov 0   ;;  %s815_s19 = smov 0  }
   0x5 LB: > { %s557_s20 = sadd.s32 4294967295, %s776_s19   ;;  %s558_s21 = sadd.s32 4294967294, %s776_s19   ;;  %s776_s19 = sphi %s815_s19, %s16_s19   ;;  %s772_s18 = sphi %s813_s18, %s968_s18   ;;  %s768_s17 = sphi %s811_s17, %s967_s17   ;;  %s764_s16 = sphi %s809_s16, %s966_s16   ;;  %s760_s15 = sphi %s807_s15, %s965_s15   ;;  %s756_s14 = sphi %s805_s14, %s964_s14   ;;  %s752_s13 = sphi %s803_s13, %s963_s13   ;;  %s748_s12 = sphi %s801_s12, %s962_s12  }
   0x6   : > { %s28_s22 = sadd.s32 1, %s768_s17  ;;  %s35_s23 = sadd.s32 1, %s772_s18 }
   0x7   : > { %p29_p0 = scmp.ge.s32.totalorder %s28_s22, 2  ;;  %p134_p1 = scmp.ne.s32.totalorder %s756_s14, %s752_s13 }
   0x8   : > { %p135_p2 = scmp.eq.s32.totalorder %s557_s20, 3  ;;  %p140_p4 = scmp.ne.s32.totalorder %s752_s13, %s748_s12 }
   0x9   : > { %s970_s22 = smov (%p29_p0, %s28_s22), 0  ;;  %s972_s23 = smov (!%p29_p0, %s35_s23), %s772_s18 }
   0xa   : > { %p850_p3 = por %p135_p2, %p134_p1  ;;  %p37_p5 = scmp.ge.s32.totalorder %s972_s23, 2 }
   0xb   : > { %p141_p6 = scmp.eq.s32.totalorder %s558_s21, 3  ;;  %p563_p7 = scmp.ge.s32.totalorder %s776_s19, 1 }
   0xc   : > { %p184_p8 = scmp.lt.s32.totalorder %s776_s19, 5  ;;  %s974_s23 = smov (%p37_p5, %s972_s23), 0 }
   0xd   : > { %p860_p9 = por %p141_p6, %p140_p4  ;;  %s119_s26 = ssub.s32 %s772_s18, %s974_s23 }
   0xe   : > { %p185_p10 = pnand %p563_p7, %p184_p8  ;;  %s124_s27 = sadd.s32 1, %s756_s14 }
   0xf   : > { %p122_p11 = scmp.eq.s32.totalorder %s119_s26, 0  ;;  %s216_s29 = sand.u32 (!%p185_p10), 1, %s752_s13  }
  0x10   : > { %188 = sbr.rel (%p185_p10) target bundleno = 438 (0x1b6), region = 32  ;;  %p218_p12 = scmp.lt.s32.totalorder (!%p185_p10), %s764_s16, 1 }
  0x11   : > { %s868_s28 = scalar_select %p122_p11, %s756_s14, %s124_s27  }
  0x12   : > { %p220_p13 = scmp.lt.s32.totalorder (!%p185_p10), %s760_s15, 1  ;;  %s880_s11 = scalar_lea.vmem (!%p185_p10), [#allocation3], %s216_s29 }
  0x13   : > { %p566_p0 = scmp.ne.s32.totalorder (!%p185_p10), %s760_s15, 0 }
  0x17   : > { %s219_s30 = scalar_select %p218_p12, %s764_s16, 1 }
  0x18   : > { %s221_s4 = scalar_select %p220_p13, %s760_s15, 1 }
  0x19   : > { %s564_s5 = sshll.u32 %s219_s30, 1  ;;  %238 = sbr.rel (%p566_p0) target bundleno = 32 (0x20), region = 36  ;;  %v778_v0 = vmov (!%p566_p0), 0.0  }
  0x1a   : > { %s223_s6 = sadd.s32 %s564_s5, %s221_s4  ;;  %239 = vst [vmem:[#allocation2] sm:$0x1] (!%p566_p0), %v778_v0 }
  0x1b   : > { %s565_s7 = sshll.u32 %s223_s6, 2 }
  0x1c   : > { %s225_s10 = scalar_lea.vmem %s956_s0, %s565_s7 }
  0x20 PF: > { %v240_v1 = vld [vmem:[%s225_s10] sm:$0x7]  ;;  %vm283_vm0 = vcmask 1041408   ;;  %vm284_vm1 = vcmask 1042432   ;;  %v779_v3 = vmov 65535   ;;  %vm258_vm2 = vcmask 39936  }
  0x21   : > { %242 = vxpose.xlu0.c.b16.start.end [1/1] (short) %v240_v1, 128  ;;  %v241_v2 = vld [vmem:[%s957_s1] sm:$0x7]  ;;  %v285_v4 = vsel %vm283_vm0, 4294967295, %v779_v3  ;;  %v403_v3 = vld [vmem:[#allocation2] sm:$0x1]  ;;  %p575_p1 = scmp.ne.s32.totalorder %s760_s15, 1 }
  0x22   : > { %v286_v5 = vsel %vm284_vm1, %v285_v4, 0 }
  0x23   : > { %v288_v6 = vand.u32 %v286_v5, %v241_v2 }
  0x25   : > { %588 = vmatprep.subr.bf16.mxu0 %v288_v6  ;;  %606 = vmatprep.subr.bf16.mxu1 %v288_v6 }
  0x26   : > { %589 = vmatpush3.bf16.msra.mxu0 %v288_v6  ;;  %607 = vmatpush3.bf16.msra.mxu1 %v288_v6 }
  0x87   : > { %v250_v7 = vpop.trf.xlu0 }
  0x88   : > { %590 = vmatprep.mubr.msk.bf16.mxu0 %vm258_vm2, %v250_v7  ;;  %v432_v7 = vld [vmem:[%s958_s2] sm:$0x1] (!%p575_p1) }
  0x8b   : > { %v251_v8 = vpop.trf.xlu0 }
  0x8c   : > { %591 = vmatmul.mubr.msk.bf16.vlgmr.msra.gmra.mrb[0].mxu0 %vm258_vm2, %v251_v8  ;;  %v434_v8 = vld [vmem:[%s958_s2 + $0x1] sm:$0x1] (!%p575_p1) }
  0x8f   : > { %v252_v9 = vpop.trf.xlu0 }
  0x90   : > { %594 = vmatprep.mubr.msk.bf16.mxu0 %vm258_vm2, %v252_v9 }
  0x93   : > { %v253_v10 = vpop.trf.xlu0 }
  0x94   : > { %595 = vmatmul.mubr.msk.bf16.gmra.mrb[4].mxu0 %vm258_vm2, %v253_v10 }
  0x97   : > { %v254_v11 = vpop.trf.xlu0 }
  0x98   : > { %598 = vmatprep.mubr.msk.bf16.mxu1 %vm258_vm2, %v254_v11 }
  0x9b   : > { %v255_v12 = vpop.trf.xlu0 }
  0x9c   : > { %599 = vmatmul.mubr.msk.bf16.vlgmr.msra.gmra.mrb[0].mxu1 %vm258_vm2, %v255_v12 }
  0x9f   : > { %v256_v13 = vpop.trf.xlu0 }
  0xa0   : > { %602 = vmatprep.mubr.msk.bf16.mxu1 %vm258_vm2, %v256_v13 }
  0xa3   : > { %v257_v14 = vpop.trf.xlu0 }
  0xa4   : > { %603 = vmatmul.mubr.msk.bf16.gmra.mrb[4].mxu1 %vm258_vm2, %v257_v14 }
 0x15f   : > { %v592_v15 = vpop.f32.mrb[0].mxu0 }
 0x160   : > { %v324_v16 = vpop.f32.mrb[1].mxu0  ;;  %v389_v21 = vmax.f32 %v592_v15, 0.0 }
 0x161   : > { %v593_v17 = vpop.f32.mrb[2].mxu0  ;;  %v387_v19 = vmax.f32 %v324_v16, 0.0 }
 0x162   : > { %v327_v18 = vpop.f32.mrb[3].mxu0  ;;  %v390_v23 = vmax.f32 %v593_v17, 0.0 }
 0x163   : > { %v388_v20 = vmax.f32 %v327_v18, 0.0 }
 0x165   : > { %v404_v22 = vadd.f32 %v388_v20, %v387_v19 }
 0x167   : > { %v405_v24 = vadd.f32 %v404_v22, %v389_v21  ;;  %v596_v25 = vpop.f32.mrb[4].mxu0 }
 0x168   : > { %v340_v26 = vpop.f32.mrb[5].mxu0  ;;  %v393_v33 = vmax.f32 %v596_v25, 0.0 }
 0x169   : > { %v391_v27 = vmax.f32 %v340_v26, 0.0  ;;  %v406_v28 = vadd.f32 %v405_v24, %v390_v23  ;;  %v597_v29 = vpop.f32.mrb[6].mxu0 }
 0x16a   : > { %v343_v30 = vpop.f32.mrb[7].mxu0  ;;  %v394_v35 = vmax.f32 %v597_v29, 0.0 }
 0x16b   : > { %v407_v31 = vadd.f32 %v406_v28, %v391_v27  ;;  %v392_v32 = vmax.f32 %v343_v30, 0.0 }
 0x16d   : > { %v408_v34 = vadd.f32 %v407_v31, %v392_v32 }
 0x16f   : > { %v409_v36 = vadd.f32 %v408_v34, %v393_v33  ;;  %v600_v37 = vpop.f32.mrb[0].mxu1 }
 0x170   : > { %v356_v38 = vpop.f32.mrb[1].mxu1  ;;  %v397_v45 = vmax.f32 %v600_v37, 0.0 }
 0x171   : > { %v395_v39 = vmax.f32 %v356_v38, 0.0  ;;  %v410_v40 = vadd.f32 %v409_v36, %v394_v35  ;;  %v601_v41 = vpop.f32.mrb[2].mxu1 }
 0x172   : > { %v359_v42 = vpop.f32.mrb[3].mxu1  ;;  %v398_v47 = vmax.f32 %v601_v41, 0.0 }
 0x173   : > { %v411_v43 = vadd.f32 %v410_v40, %v395_v39  ;;  %v396_v44 = vmax.f32 %v359_v42, 0.0 }
 0x175   : > { %v412_v46 = vadd.f32 %v411_v43, %v396_v44 }
 0x177   : > { %v413_v48 = vadd.f32 %v412_v46, %v397_v45  ;;  %v604_v49 = vpop.f32.mrb[4].mxu1 }
 0x178   : > { %v372_v50 = vpop.f32.mrb[5].mxu1  ;;  %v401_v57 = vmax.f32 %v604_v49, 0.0 }
 0x179   : > { %v399_v51 = vmax.f32 %v372_v50, 0.0  ;;  %v414_v52 = vadd.f32 %v413_v48, %v398_v47  ;;  %v605_v53 = vpop.f32.mrb[6].mxu1 }
 0x17a   : > { %v375_v54 = vpop.f32.mrb[7].mxu1  ;;  %v402_v59 = vmax.f32 %v605_v53, 0.0 }
 0x17b   : > { %v415_v55 = vadd.f32 %v414_v52, %v399_v51  ;;  %v400_v56 = vmax.f32 %v375_v54, 0.0 }
 0x17d   : > { %v416_v58 = vadd.f32 %v415_v55, %v400_v56 }
 0x17f   : > { %v417_v60 = vadd.f32 %v416_v58, %v401_v57 }
 0x181   : > { %v418_v61 = vadd.f32 %v417_v60, %v402_v59 }
 0x183   : > { %v419_v62 = vrot.slane %v418_v61, 4 }
 0x185   : > { %v420_v63 = vadd.f32 %v419_v62, %v418_v61 }
 0x187   : > { %v421_v0 = vrot.slane %v420_v63, 2 }
 0x189   : > { %v422_v1 = vadd.f32 %v421_v0, %v420_v63 }
 0x18b   : > { %v423_v2 = vrot.slane %v422_v1, 1  ;;  %430 = sbr.rel (%p575_p1) target bundleno = 414 (0x19e), region = 40 }
 0x18d   : > { %v424_v4 = vadd.f32 %v423_v2, %v422_v1 }
 0x18f   : > { %v425_v5 = vadd.f32 %v424_v4, %v403_v3 }
 0x191   : > { %426 = vst [vmem:[#allocation2] sm:$0x1] %v425_v5 }
 0x198   : > { %v431_v6 = vld [vmem:[#allocation2] sm:$0x1] }
 0x199   : > { %v433_v9 = vmul.f32 %v432_v7, %v431_v6 }
 0x19b   : > { %v435_v10 = vadd.f32 %v434_v8, %v433_v9 }
 0x19d   : > { %436 = vst [vmem:[%s880_s11] sm:$0x1] %v435_v10 }
 0x19e PF: > { %s576_s15 = sshll.u32 %s764_s16, 4  ;;  %s451_s8 = sshll.u32 %s880_s11, 4  ;;  %s452_s8 = int_to_ptr.vmem [resolvable:$true] %s451_s8 }
 0x19f   : > { %s906_s7 = scalar_lea.hbm %s959_s3, %s576_s15  ;;  %s438_s9 = scalar_lea.sflag [#allocation4], %s216_s29 }
 0x1a0   : > { %s682_s10 = scalar_lea.vmem %s452_s8, 16  ;;  %s780_s20 = smov [#allocation3]  }
 0x1a1   : > { %p683_p2 = scmp.ne.s32.totalorder %s452_s8, %s682_s10  ;;  %s686_s21 = sshll.u32 %s780_s20, 4  ;;  %s687_s21 = int_to_ptr.vmem [resolvable:$false] %s686_s21 }
 0x1a2   : > { %s688_s26 = scalar_lea.vmem %s687_s21, 32  ;;  %p689_p6 = scmp.lt.s32.totalorder %s452_s8, %s687_s21 }
 0x1a3   : > { %p684_p4 = pnand %p683_p2, %p850_p3  ;;  %p690_p7 = scmp.lt.s32.totalorder %s688_s26, %s682_s10 }
 0x1a5   : > { %p685_p5 = pneg %p684_p4  ;;  %p691_p8 = por %p690_p7, %p689_p6 }
 0x1a7   : > { %p692_p10 = pnand %p691_p8, %p685_p5 }
 0x1a9   : > { %695 = shalt.err (!%p692_p10)
}
 0x1aa   : > { %s696_s16 = scalar_lea.hbm %s906_s7, 16  ;;  %s700_s27 = scalar_lea.hbm %s959_s3, 32 }
 0x1ab   : > { %p697_p11 = scmp.ne.s32.totalorder %s906_s7, %s696_s16  ;;  %p701_p0 = scmp.lt.u32.totalorder %s906_s7, %s959_s3 }
 0x1ac   : > { %p702_p1 = scmp.lt.u32.totalorder %s700_s27, %s696_s16  ;;  %p704_p4 = scmp.lt.u32.totalorder %s696_s16, %s906_s7 }
 0x1ad   : > { %p698_p12 = pnand %p697_p11, %p850_p3 }
 0x1ae   : > { %p703_p2 = por %p702_p1, %p701_p0 }
 0x1af   : > { %p699_p13 = pneg %p698_p12 }
 0x1b0   : > { %p705_p5 = por %p704_p4, %p703_p2 }
 0x1b2   : > { %p706_p6 = pnand %p705_p5, %p699_p13 }
 0x1b4   : > { %709 = shalt.err (!%p706_p6)
}
 0x1b5   : > { %608 = dma.vmem_to_hbm [thread:$0]  (%p850_p3), %s452_s8, 16, %s906_s7, %s438_s9  }
 0x1b6 PF: > { %p614_p7 = scmp.ge.s32.totalorder %s776_s19, 2  ;;  %s463_s15 = sand.u32 1, %s748_s12  }
 0x1b7   : > { %s464_s5 = scalar_lea.sflag [#allocation4], %s463_s15 }
 0x1b8   : > { %p611_p8 = pnand %p614_p7, %p860_p9 }
 0x1ba   : > { %743 = dma.done.wait (!%p611_p8), %s464_s5, 16  }
 0x1bb   : > { %745 = vsyncadd (!%p611_p8), %s464_s5, 4294967280  ;;  %s16_s19 = sadd.s32 1, %s776_s19   ;;  %s962_s12 = smov %s752_s13 }
 0x1bc   : > { %p13_p10 = scmp.ge.s32.totalorder %s16_s19, 6   ;;  %s963_s13 = smov %s756_s14 }
 0x1bd   : > { %s964_s14 = smov %s868_s28  ;;  %s965_s15 = smov %s768_s17 }
 0x1be   : > { %s966_s16 = smov %s772_s18  ;;  %s967_s17 = smov %s970_s22 }
 0x1bf   : > { %s968_s18 = smov %s974_s23  ;;  %15 = sbr.rel (!%p13_p10) target bundleno = 5 (0x5), region = 81 }
 0x1c6   :  { %468 = vsyncpa [#allocation4], 1 }
 0x1c7   :  { %470 = vsyncpa [#allocation4 + $0x1], 1 }

</bundles_post_ra>
